<compile_context>
chip_gen: v6e
topology: v6e:2x2x1
jax: 0.10.0
libtpu: 0.0.40
codegen_flags: <defaults>
</compile_context>

<pallas_src>
import jax
import jax.numpy as jnp
from jax.experimental import pallas as pl
from jax.experimental.pallas import tpu as pltpu


_LANE = 128
_SUBLANE = 8


def _round_up(x, m):
    return ((x + m - 1) // m) * m


def _pick_tb(B):
    # Largest tile in {2048,1024,512,256} that still yields >= 2 grid steps
    # (keeps both TensorCores busy on v7x); otherwise one tile covering B.
    for tb in (2048, 1024, 512, 256):
        if B >= 2 * tb:
            return tb
    return _round_up(max(B, _SUBLANE), _SUBLANE)


def _mlp_kernel(x_ref, w1_ref, b1_ref, w2t_ref, b2_ref, out_ref):
    # In-kernel f32 -> bf16 cast of the streamed x tile (VPU work hidden under DMA).
    x = x_ref[...].astype(w1_ref.dtype)                       # (TB, D) bf16
    # fc1 on the MXU, f32 accumulation; bias + ReLU in f32 on the VPU.
    h = jnp.dot(x, w1_ref[...], preferred_element_type=jnp.float32)   # (TB, Hp)
    h = jnp.maximum(h + b1_ref[...], 0.0)
    # TODO(synk): nn.Dropout(0.5) is identity in eval mode; training-mode masking
    # (pltpu.prng_seed + pltpu.prng_random_bits + rescale) intentionally not applied.
    # Transpose hidden onto lanes (XLU) so fc2 produces a class-on-sublanes result
    # and the HBM writeback is only (Cs, TB) instead of a padded (TB, 128) slab.
    h_t = h.T.astype(w2t_ref.dtype)                            # (Hp, TB) bf16
    o_t = jnp.dot(w2t_ref[...], h_t, preferred_element_type=jnp.float32)  # (Cs, TB)
    out_ref[...] = (o_t + b2_ref[...]).astype(out_ref.dtype)


def prepare_params(w1, b1, w2, b2, *, compute_dtype=jnp.bfloat16):
    """Pad/cast/transpose parameters once (hoisted out of the per-call path).

    w1: (D, H); b1: (H,); w2: (H, C); b2: (C,).
    Returns (w1_p (D,Hp) bf16, b1_p (1,Hp) f32, w2_t (Cs,Hp) bf16, b2_c (Cs,1) f32).
    Zero padding is mathematically inert: ReLU(0)=0 and padded w2 rows/cols are zero.
    """
    D, H = w1.shape
    C = w2.shape[1]
    Hp = _round_up(H, _LANE)
    Cs = _round_up(C, _SUBLANE)

    w1_p = jnp.zeros((D, Hp), compute_dtype).at[:, :H].set(w1.astype(compute_dtype))
    b1_p = jnp.zeros((1, Hp), jnp.float32).at[:, :H].set(
        b1.astype(jnp.float32)[None, :])
    # fc2 weights stored transposed: classes on sublanes, hidden on lanes.
    w2_t = jnp.zeros((Cs, Hp), compute_dtype).at[:C, :H].set(
        w2.T.astype(compute_dtype))
    b2_c = jnp.zeros((Cs, 1), jnp.float32).at[:C, :].set(
        b2.astype(jnp.float32)[:, None])
    return w1_p, b1_p, w2_t, b2_c


def category_classifier_forward(x, w1_p, b1_p, w2_t, b2_c, *,
                                num_classes, hidden_dim=64):
    """Fused fc1 -> ReLU -> (eval-mode dropout) -> fc2.

    x: (B, D) f32. Parameters must come from prepare_params(). Returns (B, C).
    """
    B, D = x.shape
    Hp = w1_p.shape[1]
    Cs = w2_t.shape[0]
    out_dtype = x.dtype

    TB = _pick_tb(B)
    Bp = _round_up(B, TB)
    n_tiles = Bp // TB

    # Only materialize a padded copy of x when the last tile is ragged.
    x_in = x if Bp == B else jnp.zeros((Bp, D), x.dtype).at[:B, :].set(x)

    # Advisory cost estimate with true (unpadded) hidden/class dims and the
    # post-optimization byte traffic.
    flops = 2 * B * (D * hidden_dim + hidden_dim * num_classes)
    bytes_accessed = (x_in.size * x_in.dtype.itemsize
                      + w1_p.size * w1_p.dtype.itemsize
                      + w2_t.size * w2_t.dtype.itemsize
                      + b1_p.size * 4 + b2_c.size * 4
                      + Cs * Bp * jnp.dtype(out_dtype).itemsize)

    out_t = pl.pallas_call(
        _mlp_kernel,
        out_shape=jax.ShapeDtypeStruct((Cs, Bp), out_dtype),
        grid_spec=pltpu.PrefetchScalarGridSpec(
            num_scalar_prefetch=0,
            grid=(n_tiles,),
            in_specs=[
                pl.BlockSpec((TB, D), lambda i: (i, 0)),    # x: batch-tiled, pipelined
                pl.BlockSpec((D, Hp), lambda i: (0, 0)),    # weights: VMEM-resident
                pl.BlockSpec((1, Hp), lambda i: (0, 0)),
                pl.BlockSpec((Cs, Hp), lambda i: (0, 0)),
                pl.BlockSpec((Cs, 1), lambda i: (0, 0)),
            ],
            # Classes on sublanes, batch on lanes: lane-dense, ~16x smaller writeback.
            out_specs=pl.BlockSpec((Cs, TB), lambda i: (0, i)),
        ),
        compiler_params=pltpu.CompilerParams(
            dimension_semantics=("parallel",)),  # batch tiles shard across TCs on v7x
        cost_estimate=pl.CostEstimate(
            flops=flops, transcendentals=0, bytes_accessed=bytes_accessed),
    )(x_in, w1_p, b1_p, w2_t, b2_c)

    # Tiny (C, B) slice + transpose back to the module's (B, C) layout.
    return out_t[:num_classes, :B].T


def init_params(key, input_dim, num_classes, hidden=64):
    # Mimic nn.Linear default init: U(-1/sqrt(fan_in), 1/sqrt(fan_in)).
    k1, k2, k3, k4 = jax.random.split(key, 4)
    lim1 = 1.0 / jnp.sqrt(input_dim)
    lim2 = 1.0 / jnp.sqrt(hidden)
    w1 = jax.random.uniform(k1, (input_dim, hidden), jnp.float32, -lim1, lim1)
    b1 = jax.random.uniform(k2, (hidden,), jnp.float32, -lim1, lim1)
    w2 = jax.random.uniform(k3, (hidden, num_classes), jnp.float32, -lim2, lim2)
    b2 = jax.random.uniform(k4, (num_classes,), jnp.float32, -lim2, lim2)
    return w1, b1, w2, b2


if __name__ == "__main__":
    key = jax.random.PRNGKey(0)
    batch, input_dim, num_classes = 8, 32, 8

    k_x, k_p = jax.random.split(key)
    x = jax.random.normal(k_x, (batch, input_dim), jnp.float32)
    w1, b1, w2, b2 = init_params(k_p, input_dim, num_classes)

    # Parameter padding/transpose hoisted to init time (done once).
    w1_p, b1_p, w2_t, b2_c = prepare_params(w1, b1, w2, b2)

    out = category_classifier_forward(
        x, w1_p, b1_p, w2_t, b2_c, num_classes=num_classes, hidden_dim=64)
    out = jax.block_until_ready(out)

    # Pure-JAX f32 reference (eval-mode dropout == identity); tolerance sized for
    # bf16 MXU inputs with f32 accumulation (h is also downcast to bf16 before fc2).
    ref = jnp.maximum(x @ w1 + b1, 0.0) @ w2 + b2
    assert out.shape == (batch, num_classes)
    assert jnp.allclose(out, ref, atol=3e-2, rtol=3e-2), \
        f"max abs err {jnp.max(jnp.abs(out - ref))}"
    print("KERNEL_OK")
</pallas_src>

<mosaic_0001>
module attributes {stable_mosaic.version = 11 : i64} {
  func.func @_mlp_kernel(%arg0: i32, %arg1: memref<8x32xf32, #tpu.memory_space<vmem>>, %arg2: memref<32x128xbf16, #tpu.memory_space<vmem>>, %arg3: memref<1x128xf32, #tpu.memory_space<vmem>>, %arg4: memref<8x128xbf16, #tpu.memory_space<vmem>>, %arg5: memref<8x1xf32, #tpu.memory_space<vmem>>, %arg6: memref<8x8xf32, #tpu.memory_space<vmem>>) attributes {dimension_semantics = [#tpu.dimension_semantics<parallel>], iteration_bounds = array<i64: 1>, scalar_prefetch = 0 : i64, scratch_operands = 0 : i64, tpu.core_type = #tpu.core_type<tc>, window_params = [{transform_indices = @transform_0, window_bounds = array<i64: 8, 32>}, {pipeline_mode = #tpu.pipeline_mode<synchronous>, transform_indices = @transform_1, window_bounds = array<i64: 32, 128>}, {pipeline_mode = #tpu.pipeline_mode<synchronous>, transform_indices = @transform_2, window_bounds = array<i64: 1, 128>}, {pipeline_mode = #tpu.pipeline_mode<synchronous>, transform_indices = @transform_3, window_bounds = array<i64: 8, 128>}, {pipeline_mode = #tpu.pipeline_mode<synchronous>, transform_indices = @transform_4, window_bounds = array<i64: 8, 1>}, {transform_indices = @transform_5, window_bounds = array<i64: 8, 8>}]} {
    %c0 = arith.constant 0 : index
    %c0_0 = arith.constant 0 : index
    %0 = vector.load %arg1[%c0, %c0_0] : memref<8x32xf32, #tpu.memory_space<vmem>>, vector<8x32xf32>
    %1 = arith.truncf %0 : vector<8x32xf32> to vector<8x32xbf16>
    %c0_1 = arith.constant 0 : index
    %c0_2 = arith.constant 0 : index
    %2 = vector.load %arg2[%c0_1, %c0_2] : memref<32x128xbf16, #tpu.memory_space<vmem>>, vector<32x128xbf16>
    %cst = arith.constant dense<0.000000e+00> : vector<8x128xf32>
    %3 = tpu.matmul %1, %2, %cst {dimension_numbers = #tpu.dot_dimension_numbers<[1], [0], [0], [1], [0, 0, 1, 1], [], []>} : vector<8x32xbf16>, vector<32x128xbf16>, vector<8x128xf32> -> vector<8x128xf32>
    %c0_3 = arith.constant 0 : index
    %c0_4 = arith.constant 0 : index
    %4 = vector.load %arg3[%c0_3, %c0_4] : memref<1x128xf32, #tpu.memory_space<vmem>>, vector<1x128xf32>
    %5 = vector.broadcast %4 : vector<1x128xf32> to vector<8x128xf32>
    %6 = arith.addf %3, %5 : vector<8x128xf32>
    %cst_5 = arith.constant 0.000000e+00 : f32
    %7 = vector.broadcast %cst_5 : f32 to vector<8x128xf32>
    %8 = arith.maximumf %6, %7 : vector<8x128xf32>
    %9 = tpu.transpose %8, [1, 0] : vector<8x128xf32> -> vector<128x8xf32>
    %10 = arith.truncf %9 : vector<128x8xf32> to vector<128x8xbf16>
    %c0_6 = arith.constant 0 : index
    %c0_7 = arith.constant 0 : index
    %11 = vector.load %arg4[%c0_6, %c0_7] : memref<8x128xbf16, #tpu.memory_space<vmem>>, vector<8x128xbf16>
    %cst_8 = arith.constant dense<0.000000e+00> : vector<8x8xf32>
    %12 = tpu.matmul %11, %10, %cst_8 {dimension_numbers = #tpu.dot_dimension_numbers<[1], [0], [0], [1], [0, 0, 1, 1], [], []>} : vector<8x128xbf16>, vector<128x8xbf16>, vector<8x8xf32> -> vector<8x8xf32>
    %c0_9 = arith.constant 0 : index
    %c0_10 = arith.constant 0 : index
    %13 = vector.load %arg5[%c0_9, %c0_10] : memref<8x1xf32, #tpu.memory_space<vmem>>, vector<8x1xf32>
    %14 = vector.broadcast %13 : vector<8x1xf32> to vector<8x8xf32>
    %15 = arith.addf %12, %14 : vector<8x8xf32>
    %c0_11 = arith.constant 0 : index
    %c0_12 = arith.constant 0 : index
    %16 = vector.load %arg6[%c0_11, %c0_12] : memref<8x8xf32, #tpu.memory_space<vmem>>, vector<8x8xf32>
    tpu.vector_store %arg6[%c0_11, %c0_12], %15 {strides = array<i32>} : memref<8x8xf32, #tpu.memory_space<vmem>>, vector<8x8xf32>,
    return
  }
  func.func @transform_0(%arg0: i32) -> (i32, i32) {
    %c0_i32 = arith.constant 0 : i32
    %c0_i32_0 = arith.constant 0 : i32
    return %arg0, %c0_i32 : i32, i32
  }
  func.func @transform_1(%arg0: i32) -> (i32, i32) {
    %c0_i32 = arith.constant 0 : i32
    %c0_i32_0 = arith.constant 0 : i32
    %c0_i32_1 = arith.constant 0 : i32
    return %c0_i32, %c0_i32_0 : i32, i32
  }
  func.func @transform_2(%arg0: i32) -> (i32, i32) {
    %c0_i32 = arith.constant 0 : i32
    %c0_i32_0 = arith.constant 0 : i32
    %c0_i32_1 = arith.constant 0 : i32
    return %c0_i32, %c0_i32_0 : i32, i32
  }
  func.func @transform_3(%arg0: i32) -> (i32, i32) {
    %c0_i32 = arith.constant 0 : i32
    %c0_i32_0 = arith.constant 0 : i32
    %c0_i32_1 = arith.constant 0 : i32
    return %c0_i32, %c0_i32_0 : i32, i32
  }
  func.func @transform_4(%arg0: i32) -> (i32, i32) {
    %c0_i32 = arith.constant 0 : i32
    %c0_i32_0 = arith.constant 0 : i32
    %c0_i32_1 = arith.constant 0 : i32
    return %c0_i32, %c0_i32_0 : i32, i32
  }
  func.func @transform_5(%arg0: i32) -> (i32, i32) {
    %c0_i32 = arith.constant 0 : i32
    %c0_i32_0 = arith.constant 0 : i32
    return %c0_i32, %arg0 : i32, i32
  }
}

</mosaic_0001>

<bundles_post_ra>
// kernel: tpu_custom_call.1
= control target key start
LH: loop header
LB: loop body
LE: loop exit
PB: predicated region body
PF: predicated region fallthrough
CT: control target
= control target key end

     0   :  { %10 = vsyncpa [#allocation3], 0  ;;  %s412_s0 = inlined_call_operand.vmem [shape: f32[8,32], index: 0, kind: input, shape index: {}]   ;;  %s413_s1 = inlined_call_operand.hbm [shape: bf16[32,128], index: 1, kind: input, shape index: {}]   ;;  %s414_s2 = inlined_call_operand.hbm [shape: f32[1,128], index: 2, kind: input, shape index: {}]   ;;  %s415_s3 = inlined_call_operand.vmem [shape: bf16[8,128], index: 3, kind: input, shape index: {}]   ;;  %s416_s4 = inlined_call_operand.vmem [shape: f32[8,1], index: 4, kind: input, shape index: {}]   ;;  %s417_s5 = inlined_call_operand.hbm [shape: f32[8,8], index: 5, kind: output, shape index: {}]  }
   0x1   :  { %11 = vsyncpa [#allocation6], 0 }
   0x2   :  { %12 = vsyncpa [#allocation4], 0  ;;  %s344_s18 = smov [#allocation2]  }
   0x3   :  { %s20_s19 = sshll.u32 %s344_s18, 4  ;;  %s21_s19 = int_to_ptr.vmem [resolvable:$true] %s20_s19 }
   0x4   :  { %s286_s20 = scalar_lea.vmem %s21_s19, 256  ;;  %p291_p1 = scmp.lt.s32.totalorder %s21_s19, %s21_s19 }
   0x5   :  { %p287_p0 = scmp.ne.s32.totalorder %s21_s19, %s286_s20  ;;  %p292_p2 = scmp.lt.s32.totalorder %s286_s20, %s286_s20 }
   0x7   :  { %p293_p3 = por %p292_p2, %p291_p1 }
   0x9   :  { %p294_p4 = pnand %p293_p3, %p287_p0 }
   0xb   :  { %297 = shalt.err (!%p294_p4)
}
   0xc   :  { %s345_s21 = smov 64   ;;  %s346_s22 = smov 4  }
   0xd   :  { %26 = dma.hbm_to_vmem [thread:$0]  %s413_s1, 256, %s21_s19, [#allocation3], %s345_s21, %s345_s21, %s346_s22  }
   0xe   :  { %s347_s25 = smov [#allocation5]  }
   0xf   :  { %s33_s26 = sshll.u32 %s347_s25, 4  ;;  %s34_s26 = int_to_ptr.vmem [resolvable:$true] %s33_s26 }
  0x10   :  { %s306_s27 = scalar_lea.vmem %s34_s26, 16  ;;  %s310_s28 = scalar_lea.vmem %s34_s26, 32 }
  0x11   :  { %p307_p5 = scmp.ne.s32.totalorder %s34_s26, %s306_s27  ;;  %p311_p6 = scmp.lt.s32.totalorder %s34_s26, %s34_s26 }
  0x12   :  { %p312_p7 = scmp.lt.s32.totalorder %s310_s28, %s306_s27 }
  0x14   :  { %p313_p8 = por %p312_p7, %p311_p6 }
  0x16   :  { %p314_p9 = pnand %p313_p8, %p307_p5 }
  0x18   :  { %317 = shalt.err (!%p314_p9)
}
  0x19   :  { %36 = dma.hbm_to_vmem [thread:$0]  %s414_s2, 16, %s34_s26, [#allocation6]  }
  0x1a   :  { %338 = dma.done.wait [#allocation3], 256  }
  0x1b   :  { %339 = vsyncadd [#allocation3], 4294967040 }
  0x1c   :  { %340 = dma.done.wait [#allocation6], 16  }
  0x1d   :  { %341 = vsyncadd [#allocation6], 4294967280  ;;  %v348_v0 = vmov 0.0   ;;  %vm349_vm0 = vmmov 0   ;;  %v276_v1 = vld [vmem:[#allocation2 + $0x8] sm:$0xff]   ;;  %v277_v2 = vld [vmem:[#allocation2] sm:$0xff]  }
  0x1e   :  { %239 = vmatprep.subr.bf16.mxu0 %v348_v0  ;;  %243 = vmatprep.mubr.msk.bf16.mxu0 %vm349_vm0, %v348_v0  ;;  %v48_v3 = vld [vmem:[%s412_s0] sm:$0xff]  ;;  %vm73_vm1 = vcmask 261120   ;;  %v223_v5 = vld [vmem:[#allocation5] ss:$0 sm:$0xff]  ;;  %v350_v12 = vmov 0   ;;  %s351_s8 = smov [#allocation7]  }
  0x1f   :  { %247 = vmatprep.subr.bf16.mxu1 %v348_v0  ;;  %263 = vmatprep.mubr.msk.bf16.mxu1 %vm349_vm0, %v348_v0  ;;  %v49_v4 = vpack.c.bf16 %v48_v3, %v48_v3  ;;  %v159_v13 = vld [vmem:[%s416_s4] sm:$0xff]  ;;  %s213_s9 = sshll.u32 %s351_s8, 4  ;;  %vm205_vm2 = vcmask 64512   ;;  %s214_s9 = int_to_ptr.vmem [resolvable:$true] %s213_s9 }
  0x20   :  { %240 = vmatpush3.bf16.msra.mxu0 %v276_v1  ;;  %v158_v38 = vld [vmem:[%s415_s3] sm:$0xf]  ;;  %s318_s10 = scalar_lea.vmem %s214_s9, 128  ;;  %p323_p11 = scmp.lt.s32.totalorder %s214_s9, %s214_s9 }
  0x21   :  { %241 = vmatprep.subr.bf16.mxu0 %v348_v0  ;;  %p319_p10 = scmp.ne.s32.totalorder %s214_s9, %s318_s10  ;;  %p324_p12 = scmp.lt.s32.totalorder %s318_s10, %s318_s10 }
  0x23   :  { %p325_p13 = por %p324_p12, %p323_p11 }
  0x24   :  { %242 = vmatpush3.bf16.msra.mxu0 %v277_v2 }
  0x25   :  { %p326_p0 = pnand %p325_p13, %p319_p10 }
  0x27   :  { %244 = vmatmul.mubr.msk.bf16.vlgmr.msra.gmra.mxu0 %vm73_vm1, %v49_v4 }
  0xe7   :  { %v111_v6 = vpop.f32.mrf.mxu0 }
  0xe8   :  { %v112_v7 = vadd.f32 %v223_v5, %v111_v6 }
  0xe9   :  { %v245_v8 = vpop.f32.mrf.mxu0 }
  0xea   :  { %v117_v9 = vmax.f32 %v112_v7, 0.0 }
  0xeb   :  { %v114_v10 = vpop.f32.mrf.mxu0 }
  0xec   :  { %118 = vxpose.xlu0.b32.start.end [1/1] (short) %v117_v9, 128 }
  0xed   :  { %v246_v11 = vpop.f32.mrf.mxu0 }
 0x115   :  { %275 = vset.pattern.permute.xlu0 %v350_v12 }
 0x151   :  { %162 = vperm.xlu0 %275, %v159_v13  }
 0x168   :  { %v134_v14 = vpop.trf.xlu0 }
 0x16c   :  { %v135_v15 = vpop.trf.xlu0 }
 0x16d   :  { %v150_v16 = vpack.c.bf16 %v135_v15, %v134_v14 }
 0x170   :  { %v136_v17 = vpop.trf.xlu0 }
 0x174   :  { %v137_v18 = vpop.trf.xlu0 }
 0x175   :  { %v151_v19 = vpack.c.bf16 %v137_v18, %v136_v17 }
 0x178   :  { %v138_v20 = vpop.trf.xlu0 }
 0x17c   :  { %v139_v21 = vpop.trf.xlu0 }
 0x17d   :  { %v152_v37 = vpack.c.bf16 %v139_v21, %v138_v20 }
 0x180   :  { %v140_v22 = vpop.trf.xlu0 }
 0x184   :  { %v141_v23 = vpop.trf.xlu0 }
 0x185   :  { %v153_v36 = vpack.c.bf16 %v141_v23, %v140_v22 }
 0x188   :  { %v142_v24 = vpop.trf.xlu0 }
 0x18c   :  { %v143_v25 = vpop.trf.xlu0 }
 0x18d   :  { %v154_v35 = vpack.c.bf16 %v143_v25, %v142_v24 }
 0x190   :  { %v144_v26 = vpop.trf.xlu0 }
 0x194   :  { %v145_v27 = vpop.trf.xlu0 }
 0x195   :  { %v155_v34 = vpack.c.bf16 %v145_v27, %v144_v26 }
 0x198   :  { %v146_v28 = vpop.trf.xlu0 }
 0x19c   :  { %v147_v29 = vpop.trf.xlu0 }
 0x19d   :  { %v156_v33 = vpack.c.bf16 %v147_v29, %v146_v28 }
 0x1a0   :  { %v148_v30 = vpop.trf.xlu0 }
 0x1a4   :  { %v149_v31 = vpop.trf.xlu0 }
 0x1a5   :  { %v157_v32 = vpack.c.bf16 %v149_v31, %v148_v30 }
 0x1a7   :  { %248 = vmatpush3.bf16.msra.mxu1 %v157_v32 }
 0x1a8   :  { %249 = vmatprep.subr.bf16.mxu1 %v348_v0 }
 0x1ab   :  { %250 = vmatpush3.bf16.msra.mxu1 %v156_v33 }
 0x1ac   :  { %251 = vmatprep.subr.bf16.mxu1 %v348_v0 }
 0x1af   :  { %252 = vmatpush3.bf16.msra.mxu1 %v155_v34 }
 0x1b0   :  { %253 = vmatprep.subr.bf16.mxu1 %v348_v0 }
 0x1b3   :  { %254 = vmatpush3.bf16.msra.mxu1 %v154_v35 }
 0x1b4   :  { %255 = vmatprep.subr.bf16.mxu1 %v348_v0 }
 0x1b7   :  { %256 = vmatpush3.bf16.msra.mxu1 %v153_v36 }
 0x1b8   :  { %257 = vmatprep.subr.bf16.mxu1 %v348_v0 }
 0x1bb   :  { %258 = vmatpush3.bf16.msra.mxu1 %v152_v37 }
 0x1bc   :  { %259 = vmatprep.subr.bf16.mxu1 %v348_v0 }
 0x1bf   :  { %260 = vmatpush3.bf16.msra.mxu1 %v151_v19 }
 0x1c0   :  { %261 = vmatprep.subr.bf16.mxu1 %v348_v0 }
 0x1c3   :  { %262 = vmatpush3.bf16.msra.mxu1 %v150_v16 }
 0x1c6   :  { %264 = vmatmul.mubr.bf16.vlgmr.msra.gmra.mxu1 %v158_v38 }
 0x1cc   :  { %v163_v39 = vpop.permute.xlu0 %162 }
 0x286   :  { %v199_v40 = vpop.f32.mrf.mxu1 }
 0x287   :  { %v200_v41 = vadd.f32 %v199_v40, %v163_v39 }
 0x288   :  { %v265_v42 = vpop.f32.mrf.mxu1 }
 0x289   :  { %206 = vst.msk [vmem:[#allocation7] sm:$0xff] %vm205_vm2, %v200_v41 }
 0x28a   :  { %v202_v43 = vpop.f32.mrf.mxu1 }
 0x28b   :  { %329 = shalt.err (!%p326_p0)
}
 0x28c   :  { %216 = dma.vmem_to_hbm [thread:$0]  %s214_s9, 128, %s417_s5, [#allocation4]   ;;  %v266_v44 = vpop.f32.mrf.mxu1 }
 0x28d   :  { %342 = dma.done.wait [#allocation4], 128  }
 0x28e   :  { %343 = vsyncadd [#allocation4], 4294967168 }
 0x28f   :  { %220 = vsyncpa [#allocation3], 1 }
 0x290   :  { %221 = vsyncpa [#allocation6], 1 }
 0x291   :  { %222 = vsyncpa [#allocation4], 1 }

</bundles_post_ra>
